<compile_context>
chip_gen: v7x
topology: tpu7x:2x2x1
jax: 0.10.0
libtpu: 0.0.40
codegen_flags: <defaults>
</compile_context>

<pallas_src>
import jax
import jax.numpy as jnp
from jax.experimental import pallas as pl
from jax.experimental.pallas import tpu as pltpu


def _round_up(x: int, m: int) -> int:
    return ((x + m - 1) // m) * m


# ----------------------------- kernels --------------------------------------


def _graph_linear_kernel(x_ref, w_ref, b_ref, out_ref):
    # x_ref: (tm, K), w_ref: (K, tn), b_ref: (1, tn), out_ref: (tm, tn)
    acc = jnp.dot(x_ref[...], w_ref[...], preferred_element_type=jnp.float32)
    out_ref[...] = (acc + b_ref[...].astype(jnp.float32)).astype(out_ref.dtype)


def _graph_linear_kernel_nobias(x_ref, w_ref, out_ref):
    out_ref[...] = jnp.dot(
        x_ref[...], w_ref[...], preferred_element_type=jnp.float32
    ).astype(out_ref.dtype)


# --------------------------- tile selection ----------------------------------


def _choose_row_tile(M: int, max_tile_m: int) -> int:
    if M <= 8:
        # Single block equal to the full row extent (always layout-legal).
        return M
    # At least 2 balanced row blocks so both v7x TensorCores get work; cap the
    # tile at max_tile_m and keep it a multiple of 8 sublanes.  The ragged
    # overhang of the last block is handled by masked stores (no padding).
    n_blocks = max(pl.cdiv(M, max_tile_m), 2)
    tm = _round_up(pl.cdiv(M, n_blocks), 8)
    return max(8, min(tm, _round_up(M, 8)))


def _choose_col_tile(N: int, max_tile_n: int) -> int:
    if N <= max_tile_n or N % 128 != 0:
        # Full-width block (equals the array dim -> always legal, W resident).
        return N
    # Large multiple of 128: lane-dense column tiles bound W's VMEM footprint.
    n_blocks = pl.cdiv(N, max_tile_n)
    return min(_round_up(pl.cdiv(N, n_blocks), 128), N)


# ------------------------------ wrapper --------------------------------------


def graph_linear_forward(x, W, b=None, *, max_tile_m: int = 512,
                         max_tile_n: int = 512, compute_dtype=None):
    """Graph_Linear forward: x @ W (+ b).

    x: (num_nodes, input_size)
    W: (input_size, hidden_size)
    b: (hidden_size,) or None
    returns: (num_nodes, hidden_size) in x's original dtype.
    """
    M, K = x.shape
    K2, N = W.shape
    assert K == K2, f"shape mismatch: x {x.shape} vs W {W.shape}"

    out_dtype = x.dtype
    if compute_dtype is not None:
        x = x.astype(compute_dtype)
        W = W.astype(compute_dtype)
    in_bytes = x.dtype.itemsize
    out_bytes = jnp.dtype(out_dtype).itemsize

    tm = _choose_row_tile(M, max_tile_m)
    tn = _choose_col_tile(N, max_tile_n)
    grid_m = pl.cdiv(M, tm)
    grid_n = pl.cdiv(N, tn)

    # W / b have a grid-constant block index iff there is a single column tile:
    # then single-buffering them is free (fetched once) and halves their VMEM.
    resident_wb = grid_n == 1

    cost = pl.CostEstimate(
        flops=2 * M * K * N,
        transcendentals=0,
        bytes_accessed=M * K * in_bytes + K * N * in_bytes + N * 4
        + M * N * out_bytes,
    )

    def run(single_buffer_wb: bool):
        def wb_spec(shape, index_map):
            if single_buffer_wb:
                return pl.BlockSpec(shape, index_map,
                                    pipeline_mode=pl.Buffered(1))
            return pl.BlockSpec(shape, index_map)

        in_specs = [
            # One row tile of x per row-grid step (constant across column tiles).
            pl.BlockSpec((tm, K), lambda i, j: (i, 0)),
            # One column tile of W per column-grid step.
            wb_spec((K, tn), lambda i, j: (0, j)),
        ]
        args = [x, W]
        if b is not None:
            in_specs.append(wb_spec((1, tn), lambda i, j: (0, j)))
            args.append(b.reshape(1, N).astype(jnp.float32))
            kernel = _graph_linear_kernel
        else:
            kernel = _graph_linear_kernel_nobias

        # Explicit VMEM budget: x + out double-buffered, W/b per buffer count.
        wb_bufs = 1 if single_buffer_wb else 2
        vmem_need = (2 * tm * K * in_bytes
                     + wb_bufs * (K * tn * in_bytes + tn * 4)
                     + 2 * tm * tn * out_bytes)
        vmem_limit = min(max(int(vmem_need * 1.2) + (4 << 20), 32 << 20),
                         128 << 20)

        return pl.pallas_call(
            kernel,
            out_shape=jax.ShapeDtypeStruct((M, N), out_dtype),
            grid_spec=pltpu.PrefetchScalarGridSpec(
                num_scalar_prefetch=0,
                grid=(grid_m, grid_n),
                in_specs=in_specs,
                out_specs=pl.BlockSpec((tm, tn), lambda i, j: (i, j)),
            ),
            compiler_params=pltpu.CompilerParams(
                dimension_semantics=("parallel", "parallel"),
                vmem_limit_bytes=vmem_limit,
            ),
            cost_estimate=cost,
        )(*args)

    if resident_wb:
        try:
            return run(True)
        except Exception:
            # pipeline_mode=pl.Buffered(1) not supported by this JAX build for
            # pallas_call BlockSpecs -> fall back to default double buffering.
            pass
    return run(False)


def _reference(x, W, b=None):
    out = x @ W
    if b is not None:
        out = out + b
    return out


if __name__ == "__main__":
    # Small shapes consistent with forward(x) = mm(x, W) + b.  num_nodes is
    # deliberately NOT a multiple of the row tile to exercise the ragged
    # (pad-free) last block.
    num_nodes, input_size, hidden_size = 19, 8, 32

    key = jax.random.PRNGKey(0)
    kx, kw, kb = jax.random.split(key, 3)
    x = jax.random.normal(kx, (num_nodes, input_size), dtype=jnp.float32)
    # Deterministic synthetic init (module's reset_parameters is external;
    # zeros-init would make the check trivial).
    W = jax.random.normal(kw, (input_size, hidden_size), dtype=jnp.float32) * 0.1
    b = jax.random.normal(kb, (hidden_size,), dtype=jnp.float32) * 0.1

    out = jax.block_until_ready(graph_linear_forward(x, W, b))
    assert out.shape == (num_nodes, hidden_size)
    assert jnp.allclose(out, _reference(x, W, b), atol=1e-5, rtol=1e-5), \
        "mismatch vs reference (bias)"

    out_nb = jax.block_until_ready(graph_linear_forward(x, W, None))
    assert jnp.allclose(out_nb, _reference(x, W), atol=1e-5, rtol=1e-5), \
        "mismatch vs reference (no bias)"

    print("KERNEL_OK")
</pallas_src>

<mosaic_0001>
module attributes {stable_mosaic.version = 11 : i64} {
  func.func @_graph_linear_kernel(%arg0: i32, %arg1: i32, %arg2: memref<16x8xf32, #tpu.memory_space<vmem>>, %arg3: memref<8x32xf32, #tpu.memory_space<vmem>>, %arg4: memref<1x32xf32, #tpu.memory_space<vmem>>, %arg5: memref<16x32xf32, #tpu.memory_space<vmem>>) attributes {dimension_semantics = [#tpu.dimension_semantics<parallel>, #tpu.dimension_semantics<parallel>], iteration_bounds = array<i64: 2, 1>, scalar_prefetch = 0 : i64, scratch_operands = 0 : i64, tpu.core_type = #tpu.core_type<tc>, window_params = [{transform_indices = @transform_0, window_bounds = array<i64: 16, 8>}, {pipeline_mode = #tpu.pipeline_mode<synchronous>, transform_indices = @transform_1, window_bounds = array<i64: 8, 32>}, {pipeline_mode = #tpu.pipeline_mode<synchronous>, transform_indices = @transform_2, window_bounds = array<i64: 1, 32>}, {transform_indices = @transform_3, window_bounds = array<i64: 16, 32>}]} {
    %c0 = arith.constant 0 : index
    %c0_0 = arith.constant 0 : index
    %0 = vector.load %arg2[%c0, %c0_0] : memref<16x8xf32, #tpu.memory_space<vmem>>, vector<16x8xf32>
    %c0_1 = arith.constant 0 : index
    %c0_2 = arith.constant 0 : index
    %1 = vector.load %arg3[%c0_1, %c0_2] : memref<8x32xf32, #tpu.memory_space<vmem>>, vector<8x32xf32>
    %cst = arith.constant dense<0.000000e+00> : vector<16x32xf32>
    %2 = tpu.matmul %0, %1, %cst {dimension_numbers = #tpu.dot_dimension_numbers<[1], [0], [0], [1], [0, 0, 1, 1], [], []>} : vector<16x8xf32>, vector<8x32xf32>, vector<16x32xf32> -> vector<16x32xf32>
    %c0_3 = arith.constant 0 : index
    %c0_4 = arith.constant 0 : index
    %3 = vector.load %arg4[%c0_3, %c0_4] : memref<1x32xf32, #tpu.memory_space<vmem>>, vector<1x32xf32>
    %4 = vector.broadcast %3 : vector<1x32xf32> to vector<16x32xf32>
    %5 = arith.addf %2, %4 : vector<16x32xf32>
    %c0_5 = arith.constant 0 : index
    %c0_6 = arith.constant 0 : index
    %6 = vector.load %arg5[%c0_5, %c0_6] : memref<16x32xf32, #tpu.memory_space<vmem>>, vector<16x32xf32>
    tpu.vector_store %arg5[%c0_5, %c0_6], %5 {strides = array<i32>} : memref<16x32xf32, #tpu.memory_space<vmem>>, vector<16x32xf32>,
    return
  }
  func.func @transform_0(%arg0: i32, %arg1: i32) -> (i32, i32) {
    %c0_i32 = arith.constant 0 : i32
    %c0_i32_0 = arith.constant 0 : i32
    return %arg0, %c0_i32 : i32, i32
  }
  func.func @transform_1(%arg0: i32, %arg1: i32) -> (i32, i32) {
    %c0_i32 = arith.constant 0 : i32
    %c0_i32_0 = arith.constant 0 : i32
    return %c0_i32, %arg1 : i32, i32
  }
  func.func @transform_2(%arg0: i32, %arg1: i32) -> (i32, i32) {
    %c0_i32 = arith.constant 0 : i32
    %c0_i32_0 = arith.constant 0 : i32
    return %c0_i32, %arg1 : i32, i32
  }
  func.func @transform_3(%arg0: i32, %arg1: i32) -> (i32, i32) {
    %c0_i32 = arith.constant 0 : i32
    return %arg0, %arg1 : i32, i32
  }
}

module attributes {stable_mosaic.version = 11 : i64} {
  func.func @_graph_linear_kernel(%arg0: i32, %arg1: i32, %arg2: memref<16x8xf32, #tpu.memory_space<vmem>>, %arg3: memref<8x32xf32, #tpu.memory_space<vmem>>, %arg4: memref<1x32xf32, #tpu.memory_space<vmem>>, %arg5: memref<16x32xf32, #tpu.memory_space<vmem>>) attributes {dimension_semantics = [#tpu.dimension_semantics<parallel>, #tpu.dimension_semantics<parallel>], iteration_bounds = array<i64: 2, 1>, scalar_prefetch = 0 : i64, scratch_operands = 0 : i64, tpu.core_type = #tpu.core_type<tc>, window_params = [{transform_indices = @transform_0, window_bounds = array<i64: 16, 8>}, {transform_indices = @transform_1, window_bounds = array<i64: 8, 32>}, {transform_indices = @transform_2, window_bounds = array<i64: 1, 32>}, {transform_indices = @transform_3, window_bounds = array<i64: 16, 32>}]} {
    %c0 = arith.constant 0 : index
    %c0_0 = arith.constant 0 : index
    %0 = vector.load %arg2[%c0, %c0_0] : memref<16x8xf32, #tpu.memory_space<vmem>>, vector<16x8xf32>
    %c0_1 = arith.constant 0 : index
    %c0_2 = arith.constant 0 : index
    %1 = vector.load %arg3[%c0_1, %c0_2] : memref<8x32xf32, #tpu.memory_space<vmem>>, vector<8x32xf32>
    %cst = arith.constant dense<0.000000e+00> : vector<16x32xf32>
    %2 = tpu.matmul %0, %1, %cst {dimension_numbers = #tpu.dot_dimension_numbers<[1], [0], [0], [1], [0, 0, 1, 1], [], []>} : vector<16x8xf32>, vector<8x32xf32>, vector<16x32xf32> -> vector<16x32xf32>
    %c0_3 = arith.constant 0 : index
    %c0_4 = arith.constant 0 : index
    %3 = vector.load %arg4[%c0_3, %c0_4] : memref<1x32xf32, #tpu.memory_space<vmem>>, vector<1x32xf32>
    %4 = vector.broadcast %3 : vector<1x32xf32> to vector<16x32xf32>
    %5 = arith.addf %2, %4 : vector<16x32xf32>
    %c0_5 = arith.constant 0 : index
    %c0_6 = arith.constant 0 : index
    %6 = vector.load %arg5[%c0_5, %c0_6] : memref<16x32xf32, #tpu.memory_space<vmem>>, vector<16x32xf32>
    tpu.vector_store %arg5[%c0_5, %c0_6], %5 {strides = array<i32>} : memref<16x32xf32, #tpu.memory_space<vmem>>, vector<16x32xf32>,
    return
  }
  func.func @transform_0(%arg0: i32, %arg1: i32) -> (i32, i32) {
    %c0_i32 = arith.constant 0 : i32
    %c0_i32_0 = arith.constant 0 : i32
    return %arg0, %c0_i32 : i32, i32
  }
  func.func @transform_1(%arg0: i32, %arg1: i32) -> (i32, i32) {
    %c0_i32 = arith.constant 0 : i32
    %c0_i32_0 = arith.constant 0 : i32
    return %c0_i32, %arg1 : i32, i32
  }
  func.func @transform_2(%arg0: i32, %arg1: i32) -> (i32, i32) {
    %c0_i32 = arith.constant 0 : i32
    %c0_i32_0 = arith.constant 0 : i32
    return %c0_i32, %arg1 : i32, i32
  }
  func.func @transform_3(%arg0: i32, %arg1: i32) -> (i32, i32) {
    %c0_i32 = arith.constant 0 : i32
    return %arg0, %arg1 : i32, i32
  }
}

</mosaic_0001>

<bundles_post_ra>
// kernel: tpu_custom_call.1
= control target key start
LH: loop header
LB: loop body
LE: loop exit
PB: predicated region body
PF: predicated region fallthrough
CT: control target
= control target key end

     0   :  { %8 = vsyncpa [#allocation3], 0  ;;  %s776_s0 = inlined_call_operand.vmem [shape: f32[19,8], index: 0, kind: input, shape index: {}]   ;;  %s777_s1 = inlined_call_operand.vmem [shape: f32[8,32], index: 1, kind: input, shape index: {}]   ;;  %s778_s2 = inlined_call_operand.vmem [shape: f32[1,32], index: 2, kind: input, shape index: {}]   ;;  %s779_s3 = inlined_call_operand.hbm [shape: f32[19,32], index: 3, kind: output, shape index: {}]  }
   0x1   :  { %10 = vsyncpa [#allocation3 + $0x1], 0  ;;  %s646_s12 = smov 0   ;;  %s648_s13 = smov 0  }
   0x2   :  { %s650_s14 = smov 0   ;;  %s652_s15 = smov 0  }
   0x3   :  { %s654_s16 = smov 0   ;;  %s656_s17 = smov 0  }
   0x4 LB: > { %s456_s18 = sadd.s32 4294967295, %s621_s17   ;;  %s457_s19 = sadd.s32 4294967294, %s621_s17   ;;  %s621_s17 = sphi %s656_s17, %s16_s17   ;;  %s617_s16 = sphi %s654_s16, %s786_s16   ;;  %s613_s15 = sphi %s652_s15, %s785_s15   ;;  %s609_s14 = sphi %s650_s14, %s784_s14   ;;  %s605_s13 = sphi %s648_s13, %s783_s13   ;;  %s601_s12 = sphi %s646_s12, %s782_s12  }
   0x5   : > { %s28_s20 = sadd.s32 1, %s617_s16  ;;  %s115_s21 = sadd.s32 1, %s609_s14 }
   0x6   : > { %p30_p0 = scmp.ge.s32.totalorder %s28_s20, 2  ;;  %p125_p1 = scmp.ne.s32.totalorder %s609_s14, %s605_s13 }
   0x7   : > { %p126_p2 = scmp.eq.s32.totalorder %s456_s18, 1  ;;  %p131_p3 = scmp.ne.s32.totalorder %s605_s13, %s601_s12 }
   0x8   : > { %s788_s20 = smov (%p30_p0, %s28_s20), 0  ;;  %p132_p5 = scmp.eq.s32.totalorder %s457_s19, 1 }
   0x9   : > { %p686_p4 = por %p126_p2, %p125_p1  ;;  %s110_s23 = ssub.s32 %s617_s16, %s788_s20 }
   0xa   : > { %p462_p6 = scmp.ge.s32.totalorder %s621_s17, 1  ;;  %p113_p7 = scmp.eq.s32.totalorder %s110_s23, 0 }
   0xb   : > { %p693_p8 = por %p132_p5, %p131_p3  ;;  %p180_p9 = scmp.lt.s32.totalorder %s621_s17, 3 }
   0xc   : > { %s699_s25 = scalar_select %p113_p7, %s609_s14, %s115_s21  }
   0xd   : > { %p181_p10 = pnand %p462_p6, %p180_p9 }
   0xe   : > { %v243_v0 = vld [vmem:[%s777_s1] sm:$0xff] (!%p181_p10)  ;;  %s464_s28 = sshll.u32 (!%p181_p10), %s613_s15, 1  ;;  %vm251_vm0 = vcmask (!%p181_p10), 64512   ;;  %s212_s7 = sand.u32 (!%p181_p10), 1, %s605_s13   ;;  %vm333_vm1 = vcmask (!%p181_p10), 261120  }
   0xf   : > { %184 = sbr.rel (%p181_p10) target bundleno = 272 (0x110), region = 32  ;;  %482 = vmatprep.subr.mxu0 (!%p181_p10), %v243_v0  ;;  %p220_p11 = scmp.lt.s32.totalorder (!%p181_p10), %s464_s28, 2  ;;  %v466_v3 = vld [vmem:[%s778_s2] ss:$0 sm:$0xff] (!%p181_p10) }
  0x10   : > { %483 = vmatpush3.msra.mxu0 (!%p181_p10), %v243_v0  ;;  %s463_s8 = sshll.u32 (!%p181_p10), %s212_s7, 4  ;;  %s712_s18 = scalar_lea.sflag (!%p181_p10), [#allocation3], %s212_s7 }
  0x11   : > { %s214_s11 = scalar_lea.vmem (!%p181_p10), [#allocation2], %s463_s8 }
  0x16   : > { %s221_s29 = scalar_select %p220_p11, %s464_s28, 2 }
  0x17   : > { %s345_s19 = ssub.s32 (%p686_p4), 3, %s464_s28 }
  0x18   : > { %s465_s30 = sshll.u32 %s221_s29, 3  ;;  %p346_p12 = scmp.lt.s32.totalorder (%p686_p4), %s345_s19, 2 }
  0x19   : > { %s223_s6 = scalar_lea.vmem %s776_s0, %s465_s30 }
  0x1a   : > { %v241_v1 = vld [vmem:[%s223_s6] sm:$0xff]  ;;  %v242_v2 = vld [vmem:[%s223_s6 + $0x8] sm:$0xff] }
  0x1b   : > { %484 = vmatprep.mubr.msk.f32.mxu0 %vm251_vm0, %v241_v1 }
  0x1c   : > { %485 = vmatmul.mubr.msk.f32.vlgmr.msra.gmra.mrb[0].mxu0 %vm251_vm0, %v242_v2 }
  0xed   : > { %343 = sbr.rel (!%p686_p4) target bundleno = 272 (0x110), region = 36 }
  0xef   : > { %v486_v4 = vpop.f32.mrb[0].mxu0 }
  0xf0   : > { %v330_v5 = vadd.f32 %v486_v4, %v466_v3  ;;  %v324_v6 = vpop.f32.mrb[1].mxu0 }
  0xf1   : > { %v325_v7 = vadd.f32 %v466_v3, %v324_v6 }
  0xf2   : > { %335 = vst.msk [vmem:[%s214_s11 + $0x8] sm:$0xff] %vm333_vm1, %v330_v5 }
  0xf3   : > { %334 = vst.msk [vmem:[%s214_s11] sm:$0xff] %vm333_vm1, %v325_v7 }
  0xf4   : > { %s790_s19 = smov (!%p346_p12, %s345_s19), 2 }
  0xf5   : > { %s716_s21 = sshll.u32 %s790_s19, 7 }
  0xf6   : > { %s350_s23 = ssub.s32 256, %s716_s21 }
  0xf7   : > { %351 = vsyncadd %s712_s18, %s350_s23  ;;  %p472_p13 = scmp.ne.s32.totalorder %s716_s21, 0  ;;  %s478_s26 = sshll.u32 %s613_s15, 8 }
  0xf8   : > { %s725_s22 = scalar_lea.hbm %s779_s3, %s478_s26  ;;  %s357_s28 = sshll.u32 %s214_s11, 4  ;;  %s727_s28 = int_to_ptr.vmem [resolvable:$true] %s357_s28 }
  0xf9   : > { %s543_s30 = scalar_lea.vmem %s727_s28, %s716_s21  ;;  %s623_s4 = smov [#allocation2]  }
  0xfa   : > { %p544_p0 = scmp.ne.s32.totalorder %s727_s28, %s543_s30  ;;  %s547_s5 = sshll.u32 %s623_s4, 4  ;;  %s548_s5 = int_to_ptr.vmem [resolvable:$false] %s547_s5 }
  0xfb   : > { %s549_s15 = scalar_lea.vmem %s548_s5, 512  ;;  %p550_p3 = scmp.lt.s32.totalorder %s727_s28, %s548_s5 }
  0xfc   : > { %p545_p1 = pnand %p544_p0, %p472_p13  ;;  %p551_p4 = scmp.lt.s32.totalorder %s549_s15, %s543_s30 }
  0xfe   : > { %p546_p2 = pneg %p545_p1  ;;  %p552_p5 = por %p551_p4, %p550_p3 }
 0x100   : > { %p553_p6 = pnand %p552_p5, %p546_p2 }
 0x102   : > { %556 = shalt.err (!%p553_p6)
}
 0x103   : > { %s557_s6 = scalar_lea.hbm %s725_s22, %s716_s21  ;;  %s561_s9 = scalar_lea.hbm %s779_s3, 384 }
 0x104   : > { %p558_p7 = scmp.ne.s32.totalorder %s725_s22, %s557_s6  ;;  %p562_p11 = scmp.lt.u32.totalorder %s725_s22, %s779_s3 }
 0x105   : > { %p563_p12 = scmp.lt.u32.totalorder %s561_s9, %s557_s6  ;;  %p565_p1 = scmp.lt.u32.totalorder %s557_s6, %s725_s22 }
 0x106   : > { %p559_p9 = pnand %p558_p7, %p472_p13 }
 0x107   : > { %p564_p0 = por %p563_p12, %p562_p11 }
 0x108   : > { %p560_p10 = pneg %p559_p9 }
 0x109   : > { %p566_p2 = por %p565_p1, %p564_p0 }
 0x10b   : > { %p567_p3 = pnand %p566_p2, %p560_p10 }
 0x10d   : > { %570 = shalt.err (!%p567_p3)
}
 0x10e   : > { %s624_s19 = smov 128   ;;  %s625_s23 = smov 8  }
 0x10f   : > { %363 = dma.vmem_to_hbm [thread:$0]  (%p472_p13), %s727_s28, %s716_s21, %s725_s22, %s712_s18, %s624_s19, %s624_s19, %s625_s23  }
 0x110 PF: > { %p492_p4 = scmp.ge.s32.totalorder %s621_s17, 2  ;;  %s372_s26 = sand.u32 1, %s601_s12  }
 0x111   : > { %s373_s27 = scalar_lea.sflag [#allocation3], %s372_s26 }
 0x112   : > { %p489_p5 = pnand %p492_p4, %p693_p8 }
 0x114   : > { %596 = dma.done.wait (!%p489_p5), %s373_s27, 256  }
 0x115   : > { %598 = vsyncadd (!%p489_p5), %s373_s27, 4294967040  ;;  %s16_s17 = sadd.s32 1, %s621_s17   ;;  %s782_s12 = smov %s605_s13 }
 0x116   : > { %p13_p6 = scmp.ge.s32.totalorder %s16_s17, 4   ;;  %s783_s13 = smov %s609_s14 }
 0x117   : > { %s784_s14 = smov %s699_s25  ;;  %s785_s15 = smov %s617_s16 }
 0x118   : > { %s786_s16 = smov %s788_s20  ;;  %15 = sbr.rel (!%p13_p6) target bundleno = 4 (0x4), region = 73 }
 0x11f   :  { %378 = vsyncpa [#allocation3], 1 }
 0x120   :  { %380 = vsyncpa [#allocation3 + $0x1], 1 }

// kernel: tpu_custom_call.1
= control target key start
LH: loop header
LB: loop body
LE: loop exit
PB: predicated region body
PF: predicated region fallthrough
CT: control target
= control target key end

     0   :  { %8 = vsyncpa [#allocation3], 0  ;;  %s776_s0 = inlined_call_operand.vmem [shape: f32[19,8], index: 0, kind: input, shape index: {}]   ;;  %s777_s1 = inlined_call_operand.vmem [shape: f32[8,32], index: 1, kind: input, shape index: {}]   ;;  %s778_s2 = inlined_call_operand.vmem [shape: f32[1,32], index: 2, kind: input, shape index: {}]   ;;  %s779_s3 = inlined_call_operand.hbm [shape: f32[19,32], index: 3, kind: output, shape index: {}]  }
   0x1   :  { %10 = vsyncpa [#allocation3 + $0x1], 0  ;;  %s646_s12 = smov 0   ;;  %s648_s13 = smov 0  }
   0x2   :  { %s650_s14 = smov 0   ;;  %s652_s15 = smov 0  }
   0x3   :  { %s654_s16 = smov 0   ;;  %s656_s17 = smov 0  }
   0x4 LB: > { %s456_s18 = sadd.s32 4294967295, %s621_s17   ;;  %s457_s19 = sadd.s32 4294967294, %s621_s17   ;;  %s621_s17 = sphi %s656_s17, %s16_s17   ;;  %s617_s16 = sphi %s654_s16, %s786_s16   ;;  %s613_s15 = sphi %s652_s15, %s785_s15   ;;  %s609_s14 = sphi %s650_s14, %s784_s14   ;;  %s605_s13 = sphi %s648_s13, %s783_s13   ;;  %s601_s12 = sphi %s646_s12, %s782_s12  }
   0x5   : > { %s28_s20 = sadd.s32 1, %s617_s16  ;;  %s115_s21 = sadd.s32 1, %s609_s14 }
   0x6   : > { %p30_p0 = scmp.ge.s32.totalorder %s28_s20, 2  ;;  %p125_p1 = scmp.ne.s32.totalorder %s609_s14, %s605_s13 }
   0x7   : > { %p126_p2 = scmp.eq.s32.totalorder %s456_s18, 1  ;;  %p131_p3 = scmp.ne.s32.totalorder %s605_s13, %s601_s12 }
   0x8   : > { %s788_s20 = smov (%p30_p0, %s28_s20), 0  ;;  %p132_p5 = scmp.eq.s32.totalorder %s457_s19, 1 }
   0x9   : > { %p686_p4 = por %p126_p2, %p125_p1  ;;  %s110_s23 = ssub.s32 %s617_s16, %s788_s20 }
   0xa   : > { %p462_p6 = scmp.ge.s32.totalorder %s621_s17, 1  ;;  %p113_p7 = scmp.eq.s32.totalorder %s110_s23, 0 }
   0xb   : > { %p693_p8 = por %p132_p5, %p131_p3  ;;  %p180_p9 = scmp.lt.s32.totalorder %s621_s17, 3 }
   0xc   : > { %s699_s25 = scalar_select %p113_p7, %s609_s14, %s115_s21  }
   0xd   : > { %p181_p10 = pnand %p462_p6, %p180_p9 }
   0xe   : > { %v243_v0 = vld [vmem:[%s777_s1] sm:$0xff] (!%p181_p10)  ;;  %s464_s28 = sshll.u32 (!%p181_p10), %s613_s15, 1  ;;  %vm251_vm0 = vcmask (!%p181_p10), 64512   ;;  %s212_s7 = sand.u32 (!%p181_p10), 1, %s605_s13   ;;  %vm333_vm1 = vcmask (!%p181_p10), 261120  }
   0xf   : > { %184 = sbr.rel (%p181_p10) target bundleno = 272 (0x110), region = 32  ;;  %482 = vmatprep.subr.mxu0 (!%p181_p10), %v243_v0  ;;  %p220_p11 = scmp.lt.s32.totalorder (!%p181_p10), %s464_s28, 2  ;;  %v466_v3 = vld [vmem:[%s778_s2] ss:$0 sm:$0xff] (!%p181_p10) }
  0x10   : > { %483 = vmatpush3.msra.mxu0 (!%p181_p10), %v243_v0  ;;  %s463_s8 = sshll.u32 (!%p181_p10), %s212_s7, 4  ;;  %s712_s18 = scalar_lea.sflag (!%p181_p10), [#allocation3], %s212_s7 }
  0x11   : > { %s214_s11 = scalar_lea.vmem (!%p181_p10), [#allocation2], %s463_s8 }
  0x16   : > { %s221_s29 = scalar_select %p220_p11, %s464_s28, 2 }
  0x17   : > { %s345_s19 = ssub.s32 (%p686_p4), 3, %s464_s28 }
  0x18   : > { %s465_s30 = sshll.u32 %s221_s29, 3  ;;  %p346_p12 = scmp.lt.s32.totalorder (%p686_p4), %s345_s19, 2 }
  0x19   : > { %s223_s6 = scalar_lea.vmem %s776_s0, %s465_s30 }
  0x1a   : > { %v241_v1 = vld [vmem:[%s223_s6] sm:$0xff]  ;;  %v242_v2 = vld [vmem:[%s223_s6 + $0x8] sm:$0xff] }
  0x1b   : > { %484 = vmatprep.mubr.msk.f32.mxu0 %vm251_vm0, %v241_v1 }
  0x1c   : > { %485 = vmatmul.mubr.msk.f32.vlgmr.msra.gmra.mrb[0].mxu0 %vm251_vm0, %v242_v2 }
  0xed   : > { %343 = sbr.rel (!%p686_p4) target bundleno = 272 (0x110), region = 36 }
  0xef   : > { %v486_v4 = vpop.f32.mrb[0].mxu0 }
  0xf0   : > { %v330_v5 = vadd.f32 %v486_v4, %v466_v3  ;;  %v324_v6 = vpop.f32.mrb[1].mxu0 }
  0xf1   : > { %v325_v7 = vadd.f32 %v466_v3, %v324_v6 }
  0xf2   : > { %335 = vst.msk [vmem:[%s214_s11 + $0x8] sm:$0xff] %vm333_vm1, %v330_v5 }
  0xf3   : > { %334 = vst.msk [vmem:[%s214_s11] sm:$0xff] %vm333_vm1, %v325_v7 }
  0xf4   : > { %s790_s19 = smov (!%p346_p12, %s345_s19), 2 }
  0xf5   : > { %s716_s21 = sshll.u32 %s790_s19, 7 }
  0xf6   : > { %s350_s23 = ssub.s32 256, %s716_s21 }
  0xf7   : > { %351 = vsyncadd %s712_s18, %s350_s23  ;;  %p472_p13 = scmp.ne.s32.totalorder %s716_s21, 0  ;;  %s478_s26 = sshll.u32 %s613_s15, 8 }
  0xf8   : > { %s725_s22 = scalar_lea.hbm %s779_s3, %s478_s26  ;;  %s357_s28 = sshll.u32 %s214_s11, 4  ;;  %s727_s28 = int_to_ptr.vmem [resolvable:$true] %s357_s28 }
  0xf9   : > { %s543_s30 = scalar_lea.vmem %s727_s28, %s716_s21  ;;  %s623_s4 = smov [#allocation2]  }
  0xfa   : > { %p544_p0 = scmp.ne.s32.totalorder %s727_s28, %s543_s30  ;;  %s547_s5 = sshll.u32 %s623_s4, 4  ;;  %s548_s5 = int_to_ptr.vmem [resolvable:$false] %s547_s5 }
  0xfb   : > { %s549_s15 = scalar_lea.vmem %s548_s5, 512  ;;  %p550_p3 = scmp.lt.s32.totalorder %s727_s28, %s548_s5 }
  0xfc   : > { %p545_p1 = pnand %p544_p0, %p472_p13  ;;  %p551_p4 = scmp.lt.s32.totalorder %s549_s15, %s543_s30 }
  0xfe   : > { %p546_p2 = pneg %p545_p1  ;;  %p552_p5 = por %p551_p4, %p550_p3 }
 0x100   : > { %p553_p6 = pnand %p552_p5, %p546_p2 }
 0x102   : > { %556 = shalt.err (!%p553_p6)
}
 0x103   : > { %s557_s6 = scalar_lea.hbm %s725_s22, %s716_s21  ;;  %s561_s9 = scalar_lea.hbm %s779_s3, 384 }
 0x104   : > { %p558_p7 = scmp.ne.s32.totalorder %s725_s22, %s557_s6  ;;  %p562_p11 = scmp.lt.u32.totalorder %s725_s22, %s779_s3 }
 0x105   : > { %p563_p12 = scmp.lt.u32.totalorder %s561_s9, %s557_s6  ;;  %p565_p1 = scmp.lt.u32.totalorder %s557_s6, %s725_s22 }
 0x106   : > { %p559_p9 = pnand %p558_p7, %p472_p13 }
 0x107   : > { %p564_p0 = por %p563_p12, %p562_p11 }
 0x108   : > { %p560_p10 = pneg %p559_p9 }
 0x109   : > { %p566_p2 = por %p565_p1, %p564_p0 }
 0x10b   : > { %p567_p3 = pnand %p566_p2, %p560_p10 }
 0x10d   : > { %570 = shalt.err (!%p567_p3)
}
 0x10e   : > { %s624_s19 = smov 128   ;;  %s625_s23 = smov 8  }
 0x10f   : > { %363 = dma.vmem_to_hbm [thread:$0]  (%p472_p13), %s727_s28, %s716_s21, %s725_s22, %s712_s18, %s624_s19, %s624_s19, %s625_s23  }
 0x110 PF: > { %p492_p4 = scmp.ge.s32.totalorder %s621_s17, 2  ;;  %s372_s26 = sand.u32 1, %s601_s12  }
 0x111   : > { %s373_s27 = scalar_lea.sflag [#allocation3], %s372_s26 }
 0x112   : > { %p489_p5 = pnand %p492_p4, %p693_p8 }
 0x114   : > { %596 = dma.done.wait (!%p489_p5), %s373_s27, 256  }
 0x115   : > { %598 = vsyncadd (!%p489_p5), %s373_s27, 4294967040  ;;  %s16_s17 = sadd.s32 1, %s621_s17   ;;  %s782_s12 = smov %s605_s13 }
 0x116   : > { %p13_p6 = scmp.ge.s32.totalorder %s16_s17, 4   ;;  %s783_s13 = smov %s609_s14 }
 0x117   : > { %s784_s14 = smov %s699_s25  ;;  %s785_s15 = smov %s617_s16 }
 0x118   : > { %s786_s16 = smov %s788_s20  ;;  %15 = sbr.rel (!%p13_p6) target bundleno = 4 (0x4), region = 73 }
 0x11f   :  { %378 = vsyncpa [#allocation3], 1 }
 0x120   :  { %380 = vsyncpa [#allocation3 + $0x1], 1 }

</bundles_post_ra>
